<compile_context>
chip_gen: v7x
topology: tpu7x:2x2x1
jax: 0.10.0
libtpu: 0.0.40
codegen_flags: <defaults>
</compile_context>

<pallas_src>
import functools

import jax
import jax.numpy as jnp
import numpy as np
from jax.experimental import pallas as pl
from jax.experimental.pallas import tpu as pltpu

THRESH = 0.3
DECAY = 0.2
BN_EPS = 1e-5
LANES = 128
VMEM_LIMIT_BYTES = 32 * 1024 * 1024   # safe headroom on v5e/v6e (128 MiB) and v7x (64 MiB)


def _round_up(x, m):
    return -(-x // m) * m


# ---------------------------------------------------------------------------
# Kernel A: per-image conv (3 row-matmuls, bf16 MXU) -> per-lane BN partial stats.
# Only the tiny stats tensor is written back to HBM.
# ---------------------------------------------------------------------------
def conv_stats_kernel(x_ref, w_ref, bias_ref, stats_ref, *, H):
    # x_ref:     [Hp8, Wp*Cin] f32   one zero-padded image (row-major padded rows)
    # w_ref:     [3, Wp*Cin, W*Cout] bf16  per-dy row-conv weight matrices
    # bias_ref:  [1, W*Cout]   f32   conv bias tiled across the W pixel groups
    # stats_ref: [1, 2, W*Cout] f32  row0: sum(y), row1: sum(y*y) over this image's rows
    x = x_ref[...]
    y = jnp.dot(x[0:H].astype(jnp.bfloat16), w_ref[0],
                preferred_element_type=jnp.float32)
    y = y + jnp.dot(x[1:H + 1].astype(jnp.bfloat16), w_ref[1],
                    preferred_element_type=jnp.float32)
    y = y + jnp.dot(x[2:H + 2].astype(jnp.bfloat16), w_ref[2],
                    preferred_element_type=jnp.float32)
    y = y + bias_ref[...]
    stats_ref[0, 0:1, :] = jnp.sum(y, axis=0, keepdims=True)
    stats_ref[0, 1:2, :] = jnp.sum(y * y, axis=0, keepdims=True)


def conv_stats(xp_flat, w3, bias_row, *, N, H, Hp8, WpCin, WCout):
    return pl.pallas_call(
        functools.partial(conv_stats_kernel, H=H),
        out_shape=jax.ShapeDtypeStruct((N, 2, WCout), jnp.float32),
        grid_spec=pltpu.PrefetchScalarGridSpec(
            num_scalar_prefetch=0,
            grid=(N,),
            in_specs=[
                pl.BlockSpec((Hp8, WpCin), lambda n: (n, 0)),
                pl.BlockSpec((3, WpCin, WCout), lambda n: (0, 0, 0)),
                pl.BlockSpec((1, WCout), lambda n: (0, 0)),
            ],
            out_specs=pl.BlockSpec((1, 2, WCout), lambda n: (n, 0, 0)),
        ),
        compiler_params=pltpu.CompilerParams(
            dimension_semantics=("parallel",),
            vmem_limit_bytes=VMEM_LIMIT_BYTES),
    )(xp_flat, w3, bias_row)


# ---------------------------------------------------------------------------
# Kernel B: fused conv (recomputed, cheap) + BN(affine, batch stats) + membrane
# accumulate + spike + decay, all in the packed lane-dense [H, W*Cout] layout.
# ---------------------------------------------------------------------------
def conv_bn_lif_kernel(x_ref, w_ref, scale_ref, shift_ref, mem_ref,
                       spike_ref, newmem_ref, *, H):
    x = x_ref[...]
    y = jnp.dot(x[0:H].astype(jnp.bfloat16), w_ref[0],
                preferred_element_type=jnp.float32)
    y = y + jnp.dot(x[1:H + 1].astype(jnp.bfloat16), w_ref[1],
                    preferred_element_type=jnp.float32)
    y = y + jnp.dot(x[2:H + 2].astype(jnp.bfloat16), w_ref[2],
                    preferred_element_type=jnp.float32)
    # conv bias is folded into shift_ref in the wrapper.
    mem = mem_ref[...] + y * scale_ref[...] + shift_ref[...]
    spike = (mem > THRESH).astype(jnp.float32)
    spike_ref[...] = spike
    newmem_ref[...] = mem * DECAY * (1.0 - spike)


def conv_bn_lif(xp_flat, w3, scale_row, shift_row, mem_flat,
                *, N, H, Hp8, WpCin, WCout):
    return pl.pallas_call(
        functools.partial(conv_bn_lif_kernel, H=H),
        out_shape=(
            jax.ShapeDtypeStruct((N * H, WCout), jnp.float32),   # spike
            jax.ShapeDtypeStruct((N * H, WCout), jnp.float32),   # new membrane
        ),
        grid_spec=pltpu.PrefetchScalarGridSpec(
            num_scalar_prefetch=0,
            grid=(N,),
            in_specs=[
                pl.BlockSpec((Hp8, WpCin), lambda n: (n, 0)),
                pl.BlockSpec((3, WpCin, WCout), lambda n: (0, 0, 0)),
                pl.BlockSpec((1, WCout), lambda n: (0, 0)),
                pl.BlockSpec((1, WCout), lambda n: (0, 0)),
                pl.BlockSpec((H, WCout), lambda n: (n, 0)),
            ],
            out_specs=[
                pl.BlockSpec((H, WCout), lambda n: (n, 0)),
                pl.BlockSpec((H, WCout), lambda n: (n, 0)),
            ],
        ),
        compiler_params=pltpu.CompilerParams(
            dimension_semantics=("parallel",),
            vmem_limit_bytes=VMEM_LIMIT_BYTES),
        input_output_aliases={4: 1},   # reuse prev-membrane HBM buffer for new membrane
    )(xp_flat, w3, scale_row, shift_row, mem_flat)


# ---------------------------------------------------------------------------
# NHWC / packed-layout core (no transposes) + NCHW module-interface wrapper.
# ---------------------------------------------------------------------------
def snn_2d_forward_nhwc(x_nhwc, w_hwio, conv_b, bn_gamma, bn_beta, mem_nhwc):
    N, H, W, Cin = x_nhwc.shape
    Kh, Kw, _, Cout = w_hwio.shape
    # TODO(synk): only kernel_size=3, stride=1, padding=1, dilation=1 (module defaults).
    assert (Kh, Kw) == (3, 3)
    WCout = W * Cout
    assert WCout % LANES == 0, "W*Cout must be a multiple of 128 for the packed layout"
    assert H % 8 == 0, "H must be a multiple of 8 for sublane-aligned output blocks"
    Wp, Hp = W + 2, H + 2
    WpCin = Wp * Cin
    Hp8 = _round_up(Hp, 8)
    M = N * H * W

    # Zero-padded input, one [Hp8, Wp*Cin] row-major slab per image (free reshape).
    xp = jnp.pad(x_nhwc.astype(jnp.float32),
                 ((0, 0), (1, 1 + Hp8 - Hp), (1, 1), (0, 0)))
    xp_flat = xp.reshape(N * Hp8, WpCin)

    # Row-conv weights:  w3[dy, wcol*Cin+ci, w*Cout+c] = w_hwio[dy, wcol-w, ci, c]
    # (structured scatter of the 3x3 kernel across output pixel lane-groups).
    # TODO(synk): in a multi-timestep network this only depends on the weights and
    # should be built once and reused across time steps.
    wcol = jnp.arange(Wp)
    w_idx = jnp.arange(W)[:, None, None]
    dx_idx = jnp.arange(3)[None, :, None]
    onehot = (wcol[None, None, :] == (w_idx + dx_idx)).astype(jnp.float32)  # [W,3,Wp]
    w3 = jnp.einsum('wdp,ydio->ypiwo', onehot, w_hwio.astype(jnp.float32))
    w3 = w3.reshape(3, WpCin, WCout).astype(jnp.bfloat16)

    bias_row = jnp.tile(conv_b.astype(jnp.float32), W).reshape(1, WCout)

    # Pass 1: per-image BN partial statistics (conv output never hits HBM).
    stats = conv_stats(xp_flat, w3, bias_row,
                       N=N, H=H, Hp8=Hp8, WpCin=WpCin, WCout=WCout)
    s = stats.reshape(N, 2, W, Cout).sum(axis=(0, 2))          # [2, Cout]
    mean = s[0] / M
    var = jnp.maximum(s[1] / M - mean * mean, 0.0)   # clamp E[x^2]-E[x]^2 cancellation
    inv_std = jax.lax.rsqrt(var + BN_EPS)
    scale_c = bn_gamma.astype(jnp.float32) * inv_std
    # Fold conv bias into the BN shift: bn(conv+b) = conv*scale + (b-mean)*scale + beta
    shift_c = bn_beta.astype(jnp.float32) + (conv_b.astype(jnp.float32) - mean) * scale_c
    scale_row = jnp.tile(scale_c, W).reshape(1, WCout)
    shift_row = jnp.tile(shift_c, W).reshape(1, WCout)

    # Pass 2: fused conv + BN + LIF, packed lane-dense outputs.
    mem_flat = mem_nhwc.astype(jnp.float32).reshape(N * H, WCout)
    spike_flat, newmem_flat = conv_bn_lif(
        xp_flat, w3, scale_row, shift_row, mem_flat,
        N=N, H=H, Hp8=Hp8, WpCin=WpCin, WCout=WCout)

    # TODO(synk): for large H/W add a row-block grid axis with a 2-row halo so per-step
    # VMEM stays bounded on v7x (64 MiB) and DMA overlaps compute within an image.
    spike = spike_flat.reshape(N, H, W, Cout)
    new_mem = newmem_flat.reshape(N, H, W, Cout)
    return spike, new_mem


@jax.jit
def snn_2d_forward(x_nchw, conv_w, conv_b, bn_gamma, bn_beta, prev_mem_nchw):
    """Equivalent of SNN_2d.forward(x, {'mixed_at_mem': False, ...}) with
    self.mem == prev_mem (pass zeros for is_first=True), BN in training mode.
    Returns (spike, new_mem), both NCHW.  For multi-timestep use, prefer calling
    snn_2d_forward_nhwc directly and keep mem/spikes in NHWC (no transposes)."""
    x_nhwc = jnp.transpose(x_nchw, (0, 2, 3, 1))
    w_hwio = jnp.transpose(conv_w, (2, 3, 1, 0))
    mem_nhwc = jnp.transpose(prev_mem_nchw, (0, 2, 3, 1))
    spike, new_mem = snn_2d_forward_nhwc(
        x_nhwc, w_hwio, conv_b, bn_gamma, bn_beta, mem_nhwc)
    to_nchw = lambda t: jnp.transpose(t, (0, 3, 1, 2))
    return to_nchw(spike), to_nchw(new_mem)


if __name__ == "__main__":
    key = jax.random.PRNGKey(0)
    k_x, k_w, k_b, k_g, k_be = jax.random.split(key, 5)

    N, Cin, Cout, H, W = 2, 4, 8, 16, 16

    x = jax.random.normal(k_x, (N, Cin, H, W), dtype=jnp.float32)
    conv_w = jax.random.normal(k_w, (Cout, Cin, 3, 3), dtype=jnp.float32) * 0.1
    conv_b = jax.random.normal(k_b, (Cout,), dtype=jnp.float32) * 0.1
    bn_gamma = 1.0 + 0.1 * jax.random.normal(k_g, (Cout,), dtype=jnp.float32)
    bn_beta = 0.1 * jax.random.normal(k_be, (Cout,), dtype=jnp.float32)
    prev_mem = jnp.zeros((N, Cout, H, W), dtype=jnp.float32)   # param['is_first'] = True

    spike, new_mem = snn_2d_forward(x, conv_w, conv_b, bn_gamma, bn_beta, prev_mem)
    jax.block_until_ready((spike, new_mem))

    # Pure-XLA reference (conv + BN(training) + LIF).  The kernel feeds the MXU bf16
    # operands with f32 accumulation, so the reference quantizes the conv inputs to
    # bf16 identically; all downstream math is f32 in both paths.
    xq = x.astype(jnp.bfloat16).astype(jnp.float32)
    wq = conv_w.astype(jnp.bfloat16).astype(jnp.float32)
    conv_ref = jax.lax.conv_general_dilated(
        xq, wq, window_strides=(1, 1), padding=((1, 1), (1, 1)),
        dimension_numbers=("NCHW", "OIHW", "NCHW"),
        precision=jax.lax.Precision.HIGHEST) + conv_b[None, :, None, None]
    mean_ref = jnp.mean(conv_ref, axis=(0, 2, 3))
    var_ref = jnp.var(conv_ref, axis=(0, 2, 3))                 # biased, as torch BN
    bn_ref = (conv_ref - mean_ref[None, :, None, None]) * \
        jax.lax.rsqrt(var_ref + BN_EPS)[None, :, None, None]
    bn_ref = bn_ref * bn_gamma[None, :, None, None] + bn_beta[None, :, None, None]
    mem_ref = prev_mem + bn_ref
    spike_ref = (mem_ref > THRESH).astype(jnp.float32)
    newmem_ref = mem_ref * DECAY * (1.0 - spike_ref)

    # exclude values sitting numerically on the spike threshold from the bitwise check
    safe = np.abs(np.asarray(mem_ref) - THRESH) > 1e-3
    np.testing.assert_array_equal(np.asarray(spike)[safe], np.asarray(spike_ref)[safe])
    np.testing.assert_allclose(np.asarray(new_mem)[safe], np.asarray(newmem_ref)[safe],
                               atol=1e-3, rtol=1e-3)

    print("KERNEL_OK")
</pallas_src>

<mosaic_0001>
module attributes {stable_mosaic.version = 11 : i64} {
  func.func @conv_stats_kernel(%arg0: i32, %arg1: memref<24x72xf32, #tpu.memory_space<vmem>>, %arg2: memref<3x72x128xbf16, #tpu.memory_space<vmem>>, %arg3: memref<1x128xf32, #tpu.memory_space<vmem>>, %arg4: memref<1x2x128xf32, #tpu.memory_space<vmem>>) attributes {dimension_semantics = [#tpu.dimension_semantics<parallel>], iteration_bounds = array<i64: 2>, scalar_prefetch = 0 : i64, scratch_operands = 0 : i64, tpu.core_type = #tpu.core_type<tc>, window_params = [{transform_indices = @transform_0, window_bounds = array<i64: 24, 72>}, {pipeline_mode = #tpu.pipeline_mode<synchronous>, transform_indices = @transform_1, window_bounds = array<i64: 3, 72, 128>}, {pipeline_mode = #tpu.pipeline_mode<synchronous>, transform_indices = @transform_2, window_bounds = array<i64: 1, 128>}, {transform_indices = @transform_3, window_bounds = array<i64: 1, 2, 128>}]} {
    %c0 = arith.constant 0 : index
    %c0_0 = arith.constant 0 : index
    %0 = vector.load %arg1[%c0, %c0_0] : memref<24x72xf32, #tpu.memory_space<vmem>>, vector<24x72xf32>
    %1 = vector.extract_strided_slice %0 {offsets = [0, 0], sizes = [16, 72], strides = [1, 1]} : vector<24x72xf32> to vector<16x72xf32>
    %2 = arith.truncf %1 : vector<16x72xf32> to vector<16x72xbf16>
    %c0_1 = arith.constant 0 : index
    %c0_2 = arith.constant 0 : index
    %c0_3 = arith.constant 0 : index
    %3 = vector.load %arg2[%c0_1, %c0_2, %c0_3] : memref<3x72x128xbf16, #tpu.memory_space<vmem>>, vector<1x72x128xbf16>
    %4 = vector.shape_cast %3 : vector<1x72x128xbf16> to vector<72x128xbf16>
    %cst = arith.constant dense<0.000000e+00> : vector<16x128xf32>
    %5 = tpu.matmul %2, %4, %cst {dimension_numbers = #tpu.dot_dimension_numbers<[1], [0], [0], [1], [0, 0, 1, 1], [], []>} : vector<16x72xbf16>, vector<72x128xbf16>, vector<16x128xf32> -> vector<16x128xf32>
    %6 = vector.extract_strided_slice %0 {offsets = [1, 0], sizes = [16, 72], strides = [1, 1]} : vector<24x72xf32> to vector<16x72xf32>
    %7 = arith.truncf %6 : vector<16x72xf32> to vector<16x72xbf16>
    %c1 = arith.constant 1 : index
    %c0_4 = arith.constant 0 : index
    %c0_5 = arith.constant 0 : index
    %8 = vector.load %arg2[%c1, %c0_4, %c0_5] : memref<3x72x128xbf16, #tpu.memory_space<vmem>>, vector<1x72x128xbf16>
    %9 = vector.shape_cast %8 : vector<1x72x128xbf16> to vector<72x128xbf16>
    %cst_6 = arith.constant dense<0.000000e+00> : vector<16x128xf32>
    %10 = tpu.matmul %7, %9, %cst_6 {dimension_numbers = #tpu.dot_dimension_numbers<[1], [0], [0], [1], [0, 0, 1, 1], [], []>} : vector<16x72xbf16>, vector<72x128xbf16>, vector<16x128xf32> -> vector<16x128xf32>
    %11 = arith.addf %5, %10 : vector<16x128xf32>
    %12 = vector.extract_strided_slice %0 {offsets = [2, 0], sizes = [16, 72], strides = [1, 1]} : vector<24x72xf32> to vector<16x72xf32>
    %13 = arith.truncf %12 : vector<16x72xf32> to vector<16x72xbf16>
    %c2 = arith.constant 2 : index
    %c0_7 = arith.constant 0 : index
    %c0_8 = arith.constant 0 : index
    %14 = vector.load %arg2[%c2, %c0_7, %c0_8] : memref<3x72x128xbf16, #tpu.memory_space<vmem>>, vector<1x72x128xbf16>
    %15 = vector.shape_cast %14 : vector<1x72x128xbf16> to vector<72x128xbf16>
    %cst_9 = arith.constant dense<0.000000e+00> : vector<16x128xf32>
    %16 = tpu.matmul %13, %15, %cst_9 {dimension_numbers = #tpu.dot_dimension_numbers<[1], [0], [0], [1], [0, 0, 1, 1], [], []>} : vector<16x72xbf16>, vector<72x128xbf16>, vector<16x128xf32> -> vector<16x128xf32>
    %17 = arith.addf %11, %16 : vector<16x128xf32>
    %c0_10 = arith.constant 0 : index
    %c0_11 = arith.constant 0 : index
    %18 = vector.load %arg3[%c0_10, %c0_11] : memref<1x128xf32, #tpu.memory_space<vmem>>, vector<1x128xf32>
    %19 = vector.broadcast %18 : vector<1x128xf32> to vector<16x128xf32>
    %20 = arith.addf %17, %19 : vector<16x128xf32>
    %cst_12 = arith.constant dense<0.000000e+00> : vector<128xf32>
    %21 = vector.multi_reduction <add>, %20, %cst_12 [0] : vector<16x128xf32> to vector<128xf32>
    %22 = vector.shape_cast %21 : vector<128xf32> to vector<1x128xf32>
    %c0_13 = arith.constant 0 : index
    %c0_14 = arith.constant 0 : index
    %c0_15 = arith.constant 0 : index
    %23 = vector.load %arg4[%c0_13, %c0_14, %c0_15] : memref<1x2x128xf32, #tpu.memory_space<vmem>>, vector<1x1x128xf32>
    %24 = vector.shape_cast %23 : vector<1x1x128xf32> to vector<1x128xf32>
    %25 = vector.shape_cast %22 : vector<1x128xf32> to vector<1x1x128xf32>
    tpu.vector_store %arg4[%c0_13, %c0_14, %c0_15], %25 {strides = array<i32>} : memref<1x2x128xf32, #tpu.memory_space<vmem>>, vector<1x1x128xf32>,
    %26 = arith.mulf %20, %20 : vector<16x128xf32>
    %cst_16 = arith.constant dense<0.000000e+00> : vector<128xf32>
    %27 = vector.multi_reduction <add>, %26, %cst_16 [0] : vector<16x128xf32> to vector<128xf32>
    %28 = vector.shape_cast %27 : vector<128xf32> to vector<1x128xf32>
    %c0_17 = arith.constant 0 : index
    %c1_18 = arith.constant 1 : index
    %c0_19 = arith.constant 0 : index
    %29 = vector.load %arg4[%c0_17, %c1_18, %c0_19] : memref<1x2x128xf32, #tpu.memory_space<vmem>>, vector<1x1x128xf32>
    %30 = vector.shape_cast %29 : vector<1x1x128xf32> to vector<1x128xf32>
    %31 = vector.shape_cast %28 : vector<1x128xf32> to vector<1x1x128xf32>
    tpu.vector_store %arg4[%c0_17, %c1_18, %c0_19], %31 {strides = array<i32>} : memref<1x2x128xf32, #tpu.memory_space<vmem>>, vector<1x1x128xf32>,
    return
  }
  func.func @transform_0(%arg0: i32) -> (i32, i32) {
    %c0_i32 = arith.constant 0 : i32
    %c0_i32_0 = arith.constant 0 : i32
    return %arg0, %c0_i32 : i32, i32
  }
  func.func @transform_1(%arg0: i32) -> (i32, i32, i32) {
    %c0_i32 = arith.constant 0 : i32
    %c0_i32_0 = arith.constant 0 : i32
    %c0_i32_1 = arith.constant 0 : i32
    %c0_i32_2 = arith.constant 0 : i32
    return %c0_i32, %c0_i32_0, %c0_i32_1 : i32, i32, i32
  }
  func.func @transform_2(%arg0: i32) -> (i32, i32) {
    %c0_i32 = arith.constant 0 : i32
    %c0_i32_0 = arith.constant 0 : i32
    %c0_i32_1 = arith.constant 0 : i32
    return %c0_i32, %c0_i32_0 : i32, i32
  }
  func.func @transform_3(%arg0: i32) -> (i32, i32, i32) {
    %c0_i32 = arith.constant 0 : i32
    %c0_i32_0 = arith.constant 0 : i32
    %c0_i32_1 = arith.constant 0 : i32
    return %arg0, %c0_i32, %c0_i32_0 : i32, i32, i32
  }
}

module attributes {stable_mosaic.version = 11 : i64} {
  func.func @conv_bn_lif_kernel(%arg0: i32, %arg1: memref<24x72xf32, #tpu.memory_space<vmem>>, %arg2: memref<3x72x128xbf16, #tpu.memory_space<vmem>>, %arg3: memref<1x128xf32, #tpu.memory_space<vmem>>, %arg4: memref<1x128xf32, #tpu.memory_space<vmem>>, %arg5: memref<16x128xf32, #tpu.memory_space<vmem>>, %arg6: memref<16x128xf32, #tpu.memory_space<vmem>>, %arg7: memref<16x128xf32, #tpu.memory_space<vmem>>) attributes {dimension_semantics = [#tpu.dimension_semantics<parallel>], iteration_bounds = array<i64: 2>, scalar_prefetch = 0 : i64, scratch_operands = 0 : i64, tpu.core_type = #tpu.core_type<tc>, window_params = [{transform_indices = @transform_0, window_bounds = array<i64: 24, 72>}, {pipeline_mode = #tpu.pipeline_mode<synchronous>, transform_indices = @transform_1, window_bounds = array<i64: 3, 72, 128>}, {pipeline_mode = #tpu.pipeline_mode<synchronous>, transform_indices = @transform_2, window_bounds = array<i64: 1, 128>}, {pipeline_mode = #tpu.pipeline_mode<synchronous>, transform_indices = @transform_3, window_bounds = array<i64: 1, 128>}, {transform_indices = @transform_4, window_bounds = array<i64: 16, 128>}, {transform_indices = @transform_5, window_bounds = array<i64: 16, 128>}, {transform_indices = @transform_6, window_bounds = array<i64: 16, 128>}]} {
    %c0 = arith.constant 0 : index
    %c0_0 = arith.constant 0 : index
    %0 = vector.load %arg1[%c0, %c0_0] : memref<24x72xf32, #tpu.memory_space<vmem>>, vector<24x72xf32>
    %1 = vector.extract_strided_slice %0 {offsets = [0, 0], sizes = [16, 72], strides = [1, 1]} : vector<24x72xf32> to vector<16x72xf32>
    %2 = arith.truncf %1 : vector<16x72xf32> to vector<16x72xbf16>
    %c0_1 = arith.constant 0 : index
    %c0_2 = arith.constant 0 : index
    %c0_3 = arith.constant 0 : index
    %3 = vector.load %arg2[%c0_1, %c0_2, %c0_3] : memref<3x72x128xbf16, #tpu.memory_space<vmem>>, vector<1x72x128xbf16>
    %4 = vector.shape_cast %3 : vector<1x72x128xbf16> to vector<72x128xbf16>
    %cst = arith.constant dense<0.000000e+00> : vector<16x128xf32>
    %5 = tpu.matmul %2, %4, %cst {dimension_numbers = #tpu.dot_dimension_numbers<[1], [0], [0], [1], [0, 0, 1, 1], [], []>} : vector<16x72xbf16>, vector<72x128xbf16>, vector<16x128xf32> -> vector<16x128xf32>
    %6 = vector.extract_strided_slice %0 {offsets = [1, 0], sizes = [16, 72], strides = [1, 1]} : vector<24x72xf32> to vector<16x72xf32>
    %7 = arith.truncf %6 : vector<16x72xf32> to vector<16x72xbf16>
    %c1 = arith.constant 1 : index
    %c0_4 = arith.constant 0 : index
    %c0_5 = arith.constant 0 : index
    %8 = vector.load %arg2[%c1, %c0_4, %c0_5] : memref<3x72x128xbf16, #tpu.memory_space<vmem>>, vector<1x72x128xbf16>
    %9 = vector.shape_cast %8 : vector<1x72x128xbf16> to vector<72x128xbf16>
    %cst_6 = arith.constant dense<0.000000e+00> : vector<16x128xf32>
    %10 = tpu.matmul %7, %9, %cst_6 {dimension_numbers = #tpu.dot_dimension_numbers<[1], [0], [0], [1], [0, 0, 1, 1], [], []>} : vector<16x72xbf16>, vector<72x128xbf16>, vector<16x128xf32> -> vector<16x128xf32>
    %11 = arith.addf %5, %10 : vector<16x128xf32>
    %12 = vector.extract_strided_slice %0 {offsets = [2, 0], sizes = [16, 72], strides = [1, 1]} : vector<24x72xf32> to vector<16x72xf32>
    %13 = arith.truncf %12 : vector<16x72xf32> to vector<16x72xbf16>
    %c2 = arith.constant 2 : index
    %c0_7 = arith.constant 0 : index
    %c0_8 = arith.constant 0 : index
    %14 = vector.load %arg2[%c2, %c0_7, %c0_8] : memref<3x72x128xbf16, #tpu.memory_space<vmem>>, vector<1x72x128xbf16>
    %15 = vector.shape_cast %14 : vector<1x72x128xbf16> to vector<72x128xbf16>
    %cst_9 = arith.constant dense<0.000000e+00> : vector<16x128xf32>
    %16 = tpu.matmul %13, %15, %cst_9 {dimension_numbers = #tpu.dot_dimension_numbers<[1], [0], [0], [1], [0, 0, 1, 1], [], []>} : vector<16x72xbf16>, vector<72x128xbf16>, vector<16x128xf32> -> vector<16x128xf32>
    %17 = arith.addf %11, %16 : vector<16x128xf32>
    %c0_10 = arith.constant 0 : index
    %c0_11 = arith.constant 0 : index
    %18 = vector.load %arg5[%c0_10, %c0_11] : memref<16x128xf32, #tpu.memory_space<vmem>>, vector<16x128xf32>
    %c0_12 = arith.constant 0 : index
    %c0_13 = arith.constant 0 : index
    %19 = vector.load %arg3[%c0_12, %c0_13] : memref<1x128xf32, #tpu.memory_space<vmem>>, vector<1x128xf32>
    %20 = vector.broadcast %19 : vector<1x128xf32> to vector<16x128xf32>
    %21 = arith.mulf %17, %20 : vector<16x128xf32>
    %22 = arith.addf %18, %21 : vector<16x128xf32>
    %c0_14 = arith.constant 0 : index
    %c0_15 = arith.constant 0 : index
    %23 = vector.load %arg4[%c0_14, %c0_15] : memref<1x128xf32, #tpu.memory_space<vmem>>, vector<1x128xf32>
    %24 = vector.broadcast %23 : vector<1x128xf32> to vector<16x128xf32>
    %25 = arith.addf %22, %24 : vector<16x128xf32>
    %cst_16 = arith.constant 3.000000e-01 : f32
    %26 = vector.broadcast %cst_16 : f32 to vector<16x128xf32>
    %27 = arith.cmpf ogt, %25, %26 : vector<16x128xf32>
    %28 = arith.extui %27 : vector<16x128xi1> to vector<16x128xi32>
    %29 = arith.sitofp %28 : vector<16x128xi32> to vector<16x128xf32>
    %c0_17 = arith.constant 0 : index
    %c0_18 = arith.constant 0 : index
    %30 = vector.load %arg6[%c0_17, %c0_18] : memref<16x128xf32, #tpu.memory_space<vmem>>, vector<16x128xf32>
    tpu.vector_store %arg6[%c0_17, %c0_18], %29 {strides = array<i32>} : memref<16x128xf32, #tpu.memory_space<vmem>>, vector<16x128xf32>,
    %cst_19 = arith.constant 2.000000e-01 : f32
    %31 = vector.broadcast %cst_19 : f32 to vector<16x128xf32>
    %32 = arith.mulf %25, %31 : vector<16x128xf32>
    %cst_20 = arith.constant 1.000000e+00 : f32
    %33 = vector.broadcast %cst_20 : f32 to vector<16x128xf32>
    %34 = arith.subf %33, %29 : vector<16x128xf32>
    %35 = arith.mulf %32, %34 : vector<16x128xf32>
    %c0_21 = arith.constant 0 : index
    %c0_22 = arith.constant 0 : index
    %36 = vector.load %arg7[%c0_21, %c0_22] : memref<16x128xf32, #tpu.memory_space<vmem>>, vector<16x128xf32>
    tpu.vector_store %arg7[%c0_21, %c0_22], %35 {strides = array<i32>} : memref<16x128xf32, #tpu.memory_space<vmem>>, vector<16x128xf32>,
    return
  }
  func.func @transform_0(%arg0: i32) -> (i32, i32) {
    %c0_i32 = arith.constant 0 : i32
    %c0_i32_0 = arith.constant 0 : i32
    return %arg0, %c0_i32 : i32, i32
  }
  func.func @transform_1(%arg0: i32) -> (i32, i32, i32) {
    %c0_i32 = arith.constant 0 : i32
    %c0_i32_0 = arith.constant 0 : i32
    %c0_i32_1 = arith.constant 0 : i32
    %c0_i32_2 = arith.constant 0 : i32
    return %c0_i32, %c0_i32_0, %c0_i32_1 : i32, i32, i32
  }
  func.func @transform_2(%arg0: i32) -> (i32, i32) {
    %c0_i32 = arith.constant 0 : i32
    %c0_i32_0 = arith.constant 0 : i32
    %c0_i32_1 = arith.constant 0 : i32
    return %c0_i32, %c0_i32_0 : i32, i32
  }
  func.func @transform_3(%arg0: i32) -> (i32, i32) {
    %c0_i32 = arith.constant 0 : i32
    %c0_i32_0 = arith.constant 0 : i32
    %c0_i32_1 = arith.constant 0 : i32
    return %c0_i32, %c0_i32_0 : i32, i32
  }
  func.func @transform_4(%arg0: i32) -> (i32, i32) {
    %c0_i32 = arith.constant 0 : i32
    %c0_i32_0 = arith.constant 0 : i32
    return %arg0, %c0_i32 : i32, i32
  }
  func.func @transform_5(%arg0: i32) -> (i32, i32) {
    %c0_i32 = arith.constant 0 : i32
    %c0_i32_0 = arith.constant 0 : i32
    return %arg0, %c0_i32 : i32, i32
  }
  func.func @transform_6(%arg0: i32) -> (i32, i32) {
    %c0_i32 = arith.constant 0 : i32
    %c0_i32_0 = arith.constant 0 : i32
    return %arg0, %c0_i32 : i32, i32
  }
}

</mosaic_0001>

<bundles_post_ra>
// kernel: tile.18
= control target key start
LH: loop header
LB: loop body
LE: loop exit
PB: predicated region body
PF: predicated region fallthrough
CT: control target
= control target key end

     0   :  { %s28_s0 = inlined_call_operand.vmem [shape: f32[8], index: 0, kind: input, shape index: {}]   ;;  %s29_s1 = inlined_call_operand.vmem [shape: f32[16,8], index: 1, kind: output, shape index: {}]  }
   0x1   :  { %v4_v0 = vld [vmem:[%s28_s0] ss:$0 sm:$0xff] }
   0x2   :  { %5 = vst [vmem:[%s29_s1] sm:$0xff] %v4_v0  ;;  %8 = vst [vmem:[%s29_s1 + $0x8] sm:$0xff] %v4_v0 }

// kernel: tile.19
= control target key start
LH: loop header
LB: loop body
LE: loop exit
PB: predicated region body
PF: predicated region fallthrough
CT: control target
= control target key end

     0   :  { %s131_s10 = smov 120   ;;  %s132_s11 = smov 104   ;;  %vm3_vm0 = vcmask 64512   ;;  %vm9_vm1 = vcmask 1048512   ;;  %vm15_vm2 = vcmask 982912   ;;  %vm21_vm3 = vcmask 917312   ;;  %s207_s0 = inlined_call_operand.vmem [shape: f32[16,8], index: 0, kind: input, shape index: {}]   ;;  %s208_s1 = inlined_call_operand.vmem [shape: f32[1,128], index: 1, kind: output, shape index: {}]  }
   0x1   :  { %v101_v0 = vld [vmem:[%s207_s0 + $0xf] sm:$0x1]   ;;  %v103_v1 = vld [vmem:[%s207_s0 + $0xd] sm:$0x1]   ;;  %v102_v2 = vld [vmem:[%s207_s0 + $0xe] sm:$0x1]  }
   0x2   :  { %7 = vrot.lane.b32.xlu0 %v101_v0, %s131_s10  ;;  %19 = vrot.lane.b32.xlu1 %v103_v1, %s132_s11  ;;  %v104_v3 = vld [vmem:[%s207_s0 + $0xc] sm:$0x1]   ;;  %s133_s16 = smov 112   ;;  %s134_s17 = smov 96   ;;  %v105_v4 = vld [vmem:[%s207_s0 + $0xb] sm:$0x1]  }
   0x3   :  { %v106_v5 = vld [vmem:[%s207_s0 + $0xa] sm:$0x1]   ;;  %v2_v6 = vld [vmem:[%s207_s0] sm:$0x1]   ;;  %s135_s24 = smov 88   ;;  %s136_s25 = smov 80  }
   0x4   :  { %4 = vst.msk [vmem:[#allocation0] sm:$0x1] %vm3_vm0, %v2_v6   ;;  %v107_v7 = vld [vmem:[%s207_s0 + $0x9] sm:$0x1]   ;;  %v108_v8 = vld [vmem:[%s207_s0 + $0x8] sm:$0x1]  }
   0x5   :  { %s137_s30 = smov 72   ;;  %s138_s2 = smov 64   ;;  %v109_v9 = vld [vmem:[%s207_s0 + $0x7] sm:$0x1]   ;;  %v110_v10 = vld [vmem:[%s207_s0 + $0x6] sm:$0x1]  }
   0x6   :  { %13 = vrot.lane.b32.xlu0 %v102_v2, %s133_s16  ;;  %25 = vrot.lane.b32.xlu1 %v104_v3, %s134_s17  ;;  %s139_s7 = smov 56   ;;  %s140_s8 = smov 48   ;;  %v111_v11 = vld [vmem:[%s207_s0 + $0x5] sm:$0x1]   ;;  %v112_v12 = vld [vmem:[%s207_s0 + $0x4] sm:$0x1]  }
   0x7   :  { %s141_s13 = smov 40   ;;  %s142_s14 = smov 32   ;;  %v113_v13 = vld [vmem:[%s207_s0 + $0x3] sm:$0x1]   ;;  %v114_v14 = vld [vmem:[%s207_s0 + $0x2] sm:$0x1]  }
   0x8   :  { %s143_s19 = smov 24   ;;  %s144_s20 = smov 16   ;;  %v115_v15 = vld [vmem:[%s207_s0 + $0x1] sm:$0x1]   ;;  %vm27_vm4 = vcmask 851712   ;;  %vm33_vm5 = vcmask 786112  }
   0x9   :  { %s145_s0 = smov 8   ;;  %vm39_vm6 = vcmask 720512   ;;  %vm45_vm7 = vcmask 654912   ;;  %vm51_vm8 = vcmask 589312   ;;  %vm57_vm9 = vcmask 523712  }
   0xa   :  { %31 = vrot.lane.b32.xlu0 %v105_v4, %s135_s24  ;;  %37 = vrot.lane.b32.xlu1 %v106_v5, %s136_s25  ;;  %vm63_vm10 = vcmask 458112   ;;  %vm69_vm11 = vcmask 392512   ;;  %vm75_vm12 = vcmask 326912   ;;  %vm81_vm13 = vcmask 261312  }
   0xb   :  { %vm87_vm14 = vcmask 195712   ;;  %vm93_vm15 = vcmask 130112  }
   0xe   :  { %43 = vrot.lane.b32.xlu0 %v107_v7, %s137_s30  ;;  %49 = vrot.lane.b32.xlu1 %v108_v8, %s138_s2 }
  0x12   :  { %55 = vrot.lane.b32.xlu0 %v109_v9, %s139_s7  ;;  %61 = vrot.lane.b32.xlu1 %v110_v10, %s140_s8 }
  0x16   :  { %67 = vrot.lane.b32.xlu0 %v111_v11, %s141_s13  ;;  %73 = vrot.lane.b32.xlu1 %v112_v12, %s142_s14 }
  0x1a   :  { %79 = vrot.lane.b32.xlu0 %v113_v13, %s143_s19  ;;  %85 = vrot.lane.b32.xlu1 %v114_v14, %s144_s20 }
  0x1e   :  { %91 = vrot.lane.b32.xlu0 %v115_v15, %s145_s0 }
  0x74   :  { %v8_v16 = vpop.permute.xlu0 %7   ;;  %v20_v17 = vpop.permute.xlu1 %19  }
  0x75   :  { %10 = vst.msk [vmem:[#allocation0] sm:$0x1] %vm9_vm1, %v8_v16  }
  0x78   :  { %v14_v18 = vpop.permute.xlu0 %13   ;;  %v26_v19 = vpop.permute.xlu1 %25  }
  0x79   :  { %16 = vst.msk [vmem:[#allocation0] sm:$0x1] %vm15_vm2, %v14_v18  }
  0x7a   :  { %22 = vst.msk [vmem:[#allocation0] sm:$0x1] %vm21_vm3, %v20_v17  }
  0x7b   :  { %28 = vst.msk [vmem:[#allocation0] sm:$0x1] %vm27_vm4, %v26_v19  }
  0x7c   :  { %v32_v20 = vpop.permute.xlu0 %31   ;;  %v38_v21 = vpop.permute.xlu1 %37  }
  0x7d   :  { %34 = vst.msk [vmem:[#allocation0] sm:$0x1] %vm33_vm5, %v32_v20  }
  0x7e   :  { %40 = vst.msk [vmem:[#allocation0] sm:$0x1] %vm39_vm6, %v38_v21  }
  0x80   :  { %v44_v22 = vpop.permute.xlu0 %43   ;;  %v50_v23 = vpop.permute.xlu1 %49  }
  0x81   :  { %46 = vst.msk [vmem:[#allocation0] sm:$0x1] %vm45_vm7, %v44_v22  }
  0x82   :  { %52 = vst.msk [vmem:[#allocation0] sm:$0x1] %vm51_vm8, %v50_v23  }
  0x84   :  { %v56_v24 = vpop.permute.xlu0 %55   ;;  %v62_v25 = vpop.permute.xlu1 %61  }
  0x85   :  { %58 = vst.msk [vmem:[#allocation0] sm:$0x1] %vm57_vm9, %v56_v24  }
  0x86   :  { %64 = vst.msk [vmem:[#allocation0] sm:$0x1] %vm63_vm10, %v62_v25  }
  0x88   :  { %v68_v26 = vpop.permute.xlu0 %67   ;;  %v74_v27 = vpop.permute.xlu1 %73  }
  0x89   :  { %70 = vst.msk [vmem:[#allocation0] sm:$0x1] %vm69_vm11, %v68_v26  }
  0x8a   :  { %76 = vst.msk [vmem:[#allocation0] sm:$0x1] %vm75_vm12, %v74_v27  }
  0x8c   :  { %v80_v28 = vpop.permute.xlu0 %79   ;;  %v86_v29 = vpop.permute.xlu1 %85  }
  0x8d   :  { %82 = vst.msk [vmem:[#allocation0] sm:$0x1] %vm81_vm13, %v80_v28  }
  0x8e   :  { %88 = vst.msk [vmem:[#allocation0] sm:$0x1] %vm87_vm14, %v86_v29  }
  0x90   :  { %v92_v30 = vpop.permute.xlu0 %91  }
  0x91   :  { %94 = vst.msk [vmem:[#allocation0] sm:$0x1] %vm93_vm15, %v92_v30  }
  0x98   :  { %v98_v31 = vld [vmem:[#allocation0] sm:$0x1] }
  0x99   :  { %100 = vst [vmem:[%s208_s1] sm:$0x1] %v98_v31 }

// kernel: snn_2d_forward.2
= control target key start
LH: loop header
LB: loop body
LE: loop exit
PB: predicated region body
PF: predicated region fallthrough
CT: control target
= control target key end

     0   :  { %s691_s12 = smov 0   ;;  %s788_s0 = inlined_call_operand.vmem [shape: f32[48,72], index: 0, kind: input, shape index: {}]   ;;  %s789_s1 = inlined_call_operand.vmem [shape: bf16[3,72,128], index: 1, kind: input, shape index: {}]   ;;  %s790_s2 = inlined_call_operand.vmem [shape: f32[1,128], index: 2, kind: input, shape index: {}]   ;;  %s791_s3 = inlined_call_operand.vmem [shape: f32[2,2,128], index: 3, kind: output, shape index: {}]  }
   0x1 LB: > { %s697_s13 = sadd.s32 4294967295, %s667_s12   ;;  %p534_p0 = scmp.ge.s32.totalorder %s667_s12, 1  ;;  %s667_s12 = sphi %s691_s12, %s13_s12  }
   0x2   : > { %p138_p1 = scmp.lt.s32.totalorder %s667_s12, 3 }
   0x4   : > { %p139_p2 = pnand %p534_p0, %p138_p1 }
   0x5   : > { %v646_v0 = vld [vmem:[%s789_s1 + $0x24] sm:$0xff] (!%p139_p2)   ;;  %v669_v1 = vmov (!%p139_p2), 0.0   ;;  %v648_v3 = vld [vmem:[%s789_s1 + $0x2c] sm:$0xff] (!%p139_p2)   ;;  %s161_s22 = smul.u32 (!%p139_p2), 3, %s697_s13  ;;  %vm670_vm0 = vmmov (!%p139_p2), 0   ;;  %v650_v5 = vld [vmem:[%s789_s1 + $0x34] sm:$0xff] (!%p139_p2)  }
   0x6   : > { %142 = sbr.rel (%p139_p2) target bundleno = 281 (0x119), region = 32  ;;  %594 = vmatprep.subr.bf16.mxu0 (!%p139_p2), %v669_v1  ;;  %608 = vmatprep.subr.bf16.mxu1 (!%p139_p2), %v669_v1  ;;  %v647_v2 = vld [vmem:[%s789_s1] sm:$0xff] (!%p139_p2)   ;;  %v649_v4 = vld [vmem:[%s789_s1 + $0x8] sm:$0xff] (!%p139_p2)   ;;  %v651_v6 = vld [vmem:[%s789_s1 + $0x10] sm:$0xff] (!%p139_p2)   ;;  %vm240_vm1 = vcmask (!%p139_p2), 1043456   ;;  %vm236_vm3 = vcmask (!%p139_p2), 588800  }
   0x7   : > { %595 = vmatpush3.bf16.msra.mxu0 (!%p139_p2), %v646_v0  ;;  %609 = vmatpush3.bf16.msra.mxu1 (!%p139_p2), %v647_v2  ;;  %p162_p3 = scmp.lt.s32.totalorder (!%p139_p2), %s161_s22, 5  ;;  %v652_v7 = vld [vmem:[%s789_s1 + $0x3c] sm:$0xff] (!%p139_p2)   ;;  %v654_v9 = vld [vmem:[%s789_s1 + $0x44] ss:$0 sps:$4 sm:$0xff] (!%p139_p2)   ;;  %vm196_vm2 = vsmask.f32 (!%p139_p2), 7424 }
   0x8   : > { %596 = vmatprep.subr.bf16.mxu0 (!%p139_p2), %v669_v1  ;;  %610 = vmatprep.subr.bf16.mxu1 (!%p139_p2), %v669_v1  ;;  %v653_v8 = vld [vmem:[%s789_s1 + $0x18] sm:$0xff] (!%p139_p2)   ;;  %v655_v10 = vld [vmem:[%s789_s1 + $0x20] ss:$0 sps:$4 sm:$0xff] (!%p139_p2)   ;;  %v242_v19 = vsel (!%p139_p2), %vm240_vm1, %v654_v9, 0  ;;  %v656_v24 = vld [vmem:[%s789_s1 + $0x48] sm:$0xff] (!%p139_p2)   ;;  %vm370_vm4 = vcmask (!%p139_p2), 1046528  }
   0x9   : > { %604 = vmatprep.mubr.msk.bf16.mxu0 (!%p139_p2), %vm670_vm0, %v669_v1  ;;  %618 = vmatprep.mubr.msk.bf16.mxu1 (!%p139_p2), %vm670_vm0, %v669_v1  ;;  %v315_v20 = vsel (!%p139_p2), %vm240_vm1, %v655_v10, 0  ;;  %v657_v26 = vld [vmem:[%s789_s1 + $0x50] sm:$0xff] (!%p139_p2)   ;;  %v658_v27 = vld [vmem:[%s789_s1 + $0x58] sm:$0xff] (!%p139_p2)   ;;  %v659_v28 = vld [vmem:[%s789_s1 + $0x60] sm:$0xff] (!%p139_p2)   ;;  %p167_p4 = scmp.lt.s32.totalorder (!%p139_p2), %s697_s13, 1 }
   0xa   : > { %v660_v29 = vld [vmem:[%s789_s1 + $0x68] ss:$0 sps:$4 sm:$0xff] (!%p139_p2)   ;;  %v573_v45 = vld [vmem:[%s790_s2] ss:$0 sm:$0xff] (!%p139_p2) }
   0xb   : > { %597 = vmatpush3.bf16.msra.mxu0 (!%p139_p2), %v648_v3  ;;  %611 = vmatpush3.bf16.msra.mxu1 (!%p139_p2), %v649_v4  ;;  %v405_v32 = vsel (!%p139_p2), %vm240_vm1, %v660_v29, 0 }
   0xc   : > { %598 = vmatprep.subr.bf16.mxu0 (!%p139_p2), %v669_v1  ;;  %612 = vmatprep.subr.bf16.mxu1 (!%p139_p2), %v669_v1 }
   0xd   : > { %s793_s22 = smov (!%p162_p3, %s161_s22), 5  ;;  %s795_s13 = smov (!%p167_p4, %s697_s13), 1 }
   0xe   : > { %s535_s6 = sshll.u32 %s793_s22, 3  ;;  %s536_s26 = sshll.u32 %s795_s13, 1 }
   0xf   : > { %599 = vmatpush3.bf16.msra.mxu0 %v650_v5  ;;  %s165_s11 = scalar_lea.vmem %s788_s0, %s535_s6  ;;  %613 = vmatpush3.bf16.msra.mxu1 %v651_v6  ;;  %s170_s29 = scalar_lea.vmem %s791_s3, %s536_s26 }
  0x10   : > { %600 = vmatprep.subr.bf16.mxu0 %v669_v1  ;;  %v172_v11 = vld [vmem:[%s165_s11] sm:$0xff]  ;;  %v173_v12 = vld [vmem:[%s165_s11 + $0x8] sm:$0xff]  ;;  %v174_v13 = vld [vmem:[%s165_s11 + $0x10] sm:$0xff]  ;;  %614 = vmatprep.subr.bf16.mxu1 %v669_v1 }
  0x11   : > { %v175_v14 = vpack.c.bf16 %v173_v12, %v172_v11  ;;  %v185_v15 = vpack.c.bf16 %v174_v13, %v174_v13 }
  0x13   : > { %601 = vmatpush3.bf16.msra.mxu0 %v652_v7  ;;  %v198_v16 = vshrl.u32 %v175_v14, 16  ;;  %v200_v17 = vshll.u32 %v175_v14, 16  ;;  %v205_v18 = vshll.u32 %v185_v15, 16  ;;  %615 = vmatpush3.bf16.msra.mxu1 %v653_v8  ;;  %v371_v30 = vrot.slane %v175_v14, 1 }
  0x14   : > { %602 = vmatprep.subr.bf16.mxu0 %v669_v1  ;;  %616 = vmatprep.subr.bf16.mxu1 %v669_v1  ;;  %v372_v31 = vrot.slane %v185_v15, 1 }
  0x15   : > { %v202_v21 = vrot.slane %v200_v17, 1  ;;  %v207_v22 = vrot.slane %v205_v18, 1 }
  0x16   : > { %v373_v33 = vsel %vm370_vm4, %v371_v30, %v372_v31 }
  0x17   : > { %603 = vmatpush3.bf16.msra.mxu0 %v242_v19  ;;  %v203_v23 = vor.u32 %v202_v21, %v198_v16  ;;  %617 = vmatpush3.bf16.msra.mxu1 %v315_v20 }
  0x18   : > { %622 = vmatprep.subr.bf16.mxu0 %v669_v1 }
  0x19   : > { %v208_v25 = vsel %vm196_vm2, %v203_v23, %v207_v22 }
  0x1a   : > { %605 = vmatmul.mubr.msk.bf16.vlgmr.msra.gmra.mrb[0].mxu0 %vm236_vm3, %v208_v25  ;;  %619 = vmatmul.mubr.msk.bf16.vlgmr.msra.gmra.mrb[0].mxu1 %vm236_vm3, %v175_v14 }
  0x1b   : > { %623 = vmatpush3.bf16.msra.mxu0 %v656_v24  ;;  %632 = vmatprep.mubr.msk.bf16.mxu0 %vm670_vm0, %v669_v1 }
  0x1c   : > { %624 = vmatprep.subr.bf16.mxu0 %v669_v1 }
  0x1f   : > { %625 = vmatpush3.bf16.msra.mxu0 %v657_v26 }
  0x20   : > { %626 = vmatprep.subr.bf16.mxu0 %v669_v1 }
  0x23   : > { %627 = vmatpush3.bf16.msra.mxu0 %v658_v27 }
  0x24   : > { %628 = vmatprep.subr.bf16.mxu0 %v669_v1 }
  0x27   : > { %629 = vmatpush3.bf16.msra.mxu0 %v659_v28 }
  0x28   : > { %630 = vmatprep.subr.bf16.mxu0 %v669_v1 }
  0x2b   : > { %631 = vmatpush3.bf16.msra.mxu0 %v405_v32 }
  0x2e   : > { %633 = vmatmul.mubr.msk.bf16.vlgmr.msra.gmra.mrb[4].mxu0 %vm236_vm3, %v373_v33 }
  0xed   : > { %v278_v34 = vpop.f32.mrb[0].mxu0  ;;  %v351_v35 = vpop.f32.mrb[0].mxu1 }
  0xee   : > { %v606_v36 = vpop.f32.mrb[1].mxu0  ;;  %v352_v37 = vadd.f32 %v351_v35, %v278_v34  ;;  %v620_v38 = vpop.f32.mrb[1].mxu1 }
  0xef   : > { %v281_v39 = vpop.f32.mrb[2].mxu0  ;;  %v354_v40 = vpop.f32.mrb[2].mxu1 }
  0xf0   : > { %v607_v41 = vpop.f32.mrb[3].mxu0  ;;  %v355_v42 = vadd.f32 %v354_v40, %v281_v39  ;;  %v621_v43 = vpop.f32.mrb[3].mxu1 }
 0x101   : > { %v441_v44 = vpop.f32.mrb[4].mxu0 }
 0x102   : > { %v448_v46 = vadd.f32 %v441_v44, %v352_v37  ;;  %v634_v47 = vpop.f32.mrb[5].mxu0 }
 0x103   : > { %v444_v48 = vpop.f32.mrb[6].mxu0 }
 0x104   : > { %v457_v49 = vadd.f32 %v573_v45, %v448_v46  ;;  %v449_v50 = vadd.f32 %v444_v48, %v355_v42  ;;  %v635_v51 = vpop.f32.mrb[7].mxu0 }
 0x106   : > { %v458_v52 = vadd.f32 %v573_v45, %v449_v50  ;;  %v467_v53 = vmul.f32 %v457_v49, %v457_v49 }
 0x108   : > { %v459_v54 = vadd.f32 %v458_v52, %v457_v49  ;;  %v468_v55 = vmul.f32 %v458_v52, %v458_v52 }
 0x10a   : > { %v460_v56 = vrot.slane %v459_v54, 4  ;;  %v469_v57 = vadd.f32 %v468_v55, %v467_v53 }
 0x10c   : > { %v461_v58 = vadd.f32 %v460_v56, %v459_v54  ;;  %v470_v59 = vrot.slane %v469_v57, 4 }
 0x10e   : > { %v462_v60 = vrot.slane %v461_v58, 2  ;;  %v471_v61 = vadd.f32 %v470_v59, %v469_v57 }
 0x110   : > { %v463_v62 = vadd.f32 %v462_v60, %v461_v58  ;;  %v472_v63 = vrot.slane %v471_v61, 2 }
 0x112   : > { %v464_v0 = vrot.slane %v463_v62, 1  ;;  %v473_v1 = vadd.f32 %v472_v63, %v471_v61 }
 0x114   : > { %v465_v2 = vadd.f32 %v464_v0, %v463_v62  ;;  %v474_v3 = vrot.slane %v473_v1, 1 }
 0x116   : > { %466 = vst [vmem:[%s170_s29] sm:$0x1] %v465_v2  ;;  %v475_v4 = vadd.f32 %v474_v3, %v473_v1 }
 0x118   : > { %476 = vst [vmem:[%s170_s29 + $0x1] sm:$0x1] %v475_v4 }
 0x119 PF: > { %s13_s12 = sadd.s32 1, %s667_s12  }
 0x11a   : > { %p10_p5 = scmp.ge.s32.totalorder %s13_s12, 4  }
 0x11c   :  { %12 = sbr.rel (!%p10_p5) target bundleno = 1 (0x1), region = 64 }

// kernel: snn_2d_forward.3
= control target key start
LH: loop header
LB: loop body
LE: loop exit
PB: predicated region body
PF: predicated region fallthrough
CT: control target
= control target key end

     0   :  { %s900_s21 = smov 0   ;;  %s1007_s0 = inlined_call_operand.vmem [shape: f32[48,72], index: 0, kind: input, shape index: {}]   ;;  %s1008_s1 = inlined_call_operand.vmem [shape: bf16[3,72,128], index: 1, kind: input, shape index: {}]   ;;  %s1009_s2 = inlined_call_operand.vmem [shape: f32[1,128], index: 2, kind: input, shape index: {}]   ;;  %s1010_s3 = inlined_call_operand.vmem [shape: f32[1,128], index: 3, kind: input, shape index: {}]   ;;  %s1011_s4 = inlined_call_operand.vmem [shape: f32[32,128], index: 4, kind: input, shape index: {}, may-alias: {4,6}]   ;;  %s1012_s5 = inlined_call_operand.vmem [shape: f32[32,128], index: 5, kind: output, shape index: {0}]   ;;  %s1013_s6 = inlined_call_operand.vmem [shape: f32[32,128], index: 6, kind: output, shape index: {1}, may-alias: {4,6}]  }
   0x1 LB: > { %s710_s22 = sadd.s32 4294967295, %s861_s21   ;;  %p714_p0 = scmp.ge.s32.totalorder %s861_s21, 1  ;;  %s861_s21 = sphi %s900_s21, %s17_s21  }
   0x2   : > { %p227_p1 = scmp.lt.s32.totalorder %s861_s21, 3 }
   0x4   : > { %p228_p2 = pnand %p714_p0, %p227_p1 }
   0x5   : > { %v840_v0 = vld [vmem:[%s1008_s1] sm:$0xff] (!%p228_p2)   ;;  %v863_v1 = vmov (!%p228_p2), 0.0   ;;  %v841_v2 = vld [vmem:[%s1008_s1 + $0x8] sm:$0xff] (!%p228_p2)   ;;  %vm864_vm0 = vmmov (!%p228_p2), 0   ;;  %s267_s27 = smul.u32 (!%p228_p2), 3, %s710_s22  ;;  %v842_v4 = vld [vmem:[%s1008_s1 + $0x10] sm:$0xff] (!%p228_p2)  }
   0x6   : > { %231 = sbr.rel (%p228_p2) target bundleno = 275 (0x113), region = 40  ;;  %796 = vmatprep.subr.bf16.mxu0 (!%p228_p2), %v863_v1  ;;  %782 = vmatprep.subr.bf16.mxu1 (!%p228_p2), %v863_v1  ;;  %v845_v3 = vld [vmem:[%s1008_s1 + $0x24] sm:$0xff] (!%p228_p2)   ;;  %v847_v5 = vld [vmem:[%s1008_s1 + $0x2c] sm:$0xff] (!%p228_p2)   ;;  %v843_v6 = vld [vmem:[%s1008_s1 + $0x18] sm:$0xff] (!%p228_p2)   ;;  %vm360_vm1 = vcmask (!%p228_p2), 1043456   ;;  %vm356_vm2 = vcmask (!%p228_p2), 588800  }
   0x7   : > { %797 = vmatpush3.bf16.msra.mxu0 (!%p228_p2), %v840_v0  ;;  %806 = vmatprep.mubr.msk.bf16.mxu0 (!%p228_p2), %vm864_vm0, %v863_v1  ;;  %p268_p3 = scmp.lt.s32.totalorder (!%p228_p2), %s267_s27, 5  ;;  %v844_v7 = vld [vmem:[%s1008_s1 + $0x20] ss:$0 sps:$4 sm:$0xff] (!%p228_p2)   ;;  %v849_v8 = vld [vmem:[%s1008_s1 + $0x34] sm:$0xff] (!%p228_p2)   ;;  %v853_v18 = vld [vmem:[%s1008_s1 + $0x44] ss:$0 sps:$4 sm:$0xff] (!%p228_p2)  }
   0x8   : > { %798 = vmatprep.subr.bf16.mxu0 (!%p228_p2), %v863_v1  ;;  %792 = vmatprep.mubr.msk.bf16.mxu1 (!%p228_p2), %vm864_vm0, %v863_v1  ;;  %v435_v14 = vsel (!%p228_p2), %vm360_vm1, %v844_v7, 0  ;;  %v851_v15 = vld [vmem:[%s1008_s1 + $0x3c] sm:$0xff] (!%p228_p2)   ;;  %v846_v21 = vld [vmem:[%s1008_s1 + $0x48] sm:$0xff] (!%p228_p2)   ;;  %v362_v24 = vsel (!%p228_p2), %vm360_vm1, %v853_v18, 0  ;;  %vm316_vm3 = vsmask.f32 (!%p228_p2), 7424 }
   0x9   : > { %783 = vmatpush3.bf16.msra.mxu1 (!%p228_p2), %v845_v3  ;;  %v848_v25 = vld [vmem:[%s1008_s1 + $0x50] sm:$0xff] (!%p228_p2)   ;;  %v850_v27 = vld [vmem:[%s1008_s1 + $0x58] sm:$0xff] (!%p228_p2)   ;;  %v852_v28 = vld [vmem:[%s1008_s1 + $0x60] sm:$0xff] (!%p228_p2)   ;;  %vm490_vm4 = vcmask (!%p228_p2), 1046528   ;;  %s716_s12 = sshll.u32 (!%p228_p2), %s710_s22, 1 }
   0xa   : > { %784 = vmatprep.subr.bf16.mxu1 (!%p228_p2), %v863_v1  ;;  %v854_v29 = vld [vmem:[%s1008_s1 + $0x68] ss:$0 sps:$4 sm:$0xff] (!%p228_p2)   ;;  %p274_p4 = scmp.lt.s32.totalorder (!%p228_p2), %s716_s12, 3  ;;  %v758_v39 = vld [vmem:[%s1009_s2] ss:$0 sm:$0xff] (!%p228_p2) }
   0xb   : > { %799 = vmatpush3.bf16.msra.mxu0 (!%p228_p2), %v841_v2  ;;  %v525_v32 = vsel (!%p228_p2), %vm360_vm1, %v854_v29, 0  ;;  %v759_v47 = vld [vmem:[%s1010_s3] ss:$0 sm:$0xff] (!%p228_p2) }
   0xc   : > { %800 = vmatprep.subr.bf16.mxu0 (!%p228_p2), %v863_v1 }
   0xd   : > { %s1015_s27 = smov (!%p268_p3, %s267_s27), 5  ;;  %785 = vmatpush3.bf16.msra.mxu1 %v847_v5  ;;  %s1017_s12 = smov (!%p274_p4, %s716_s12), 3 }
   0xe   : > { %s715_s14 = sshll.u32 %s1015_s27, 3  ;;  %786 = vmatprep.subr.bf16.mxu1 %v863_v1  ;;  %s717_s13 = sshll.u32 %s1017_s12, 3 }
   0xf   : > { %801 = vmatpush3.bf16.msra.mxu0 %v842_v4  ;;  %s271_s17 = scalar_lea.vmem %s1007_s0, %s715_s14  ;;  %s277_s16 = scalar_lea.vmem %s1011_s4, %s717_s13 }
  0x10   : > { %802 = vmatprep.subr.bf16.mxu0 %v863_v1  ;;  %v292_v9 = vld [vmem:[%s271_s17] sm:$0xff]  ;;  %v293_v10 = vld [vmem:[%s271_s17 + $0x8] sm:$0xff]  ;;  %v294_v12 = vld [vmem:[%s271_s17 + $0x10] sm:$0xff]  ;;  %s283_s24 = scalar_lea.vmem %s1012_s5, %s717_s13  ;;  %s289_s27 = scalar_lea.vmem %s1013_s6, %s717_s13 }
  0x11   : > { %v295_v11 = vpack.c.bf16 %v293_v10, %v292_v9  ;;  %787 = vmatpush3.bf16.msra.mxu1 %v849_v8  ;;  %v305_v16 = vpack.c.bf16 %v294_v12, %v294_v12  ;;  %v570_v42 = vld [vmem:[%s277_s16] sm:$0xff]  ;;  %v571_v48 = vld [vmem:[%s277_s16 + $0x8] sm:$0xff] }
  0x12   : > { %788 = vmatprep.subr.bf16.mxu1 %v863_v1 }
  0x13   : > { %803 = vmatpush3.bf16.msra.mxu0 %v843_v6  ;;  %v320_v13 = vshll.u32 %v295_v11, 16  ;;  %v318_v17 = vshrl.u32 %v295_v11, 16  ;;  %v325_v20 = vshll.u32 %v305_v16, 16  ;;  %v491_v30 = vrot.slane %v295_v11, 1 }
  0x14   : > { %804 = vmatprep.subr.bf16.mxu0 %v863_v1  ;;  %v492_v31 = vrot.slane %v305_v16, 1 }
  0x15   : > { %v322_v19 = vrot.slane %v320_v13, 1  ;;  %789 = vmatpush3.bf16.msra.mxu1 %v851_v15  ;;  %v327_v23 = vrot.slane %v325_v20, 1 }
  0x16   : > { %790 = vmatprep.subr.bf16.mxu1 %v863_v1  ;;  %v493_v33 = vsel %vm490_vm4, %v491_v30, %v492_v31 }
  0x17   : > { %805 = vmatpush3.bf16.msra.mxu0 %v435_v14  ;;  %v323_v22 = vor.u32 %v322_v19, %v318_v17 }
  0x18   : > { %810 = vmatprep.subr.bf16.mxu0 %v863_v1 }
  0x19   : > { %791 = vmatpush3.bf16.msra.mxu1 %v362_v24  ;;  %v328_v26 = vsel %vm316_vm3, %v323_v22, %v327_v23 }
  0x1a   : > { %807 = vmatmul.mubr.msk.bf16.vlgmr.msra.gmra.mrb[0].mxu0 %vm356_vm2, %v295_v11 }
  0x1b   : > { %811 = vmatpush3.bf16.msra.mxu0 %v846_v21  ;;  %820 = vmatprep.mubr.msk.bf16.mxu0 %vm864_vm0, %v863_v1 }
  0x1c   : > { %812 = vmatprep.subr.bf16.mxu0 %v863_v1  ;;  %793 = vmatmul.mubr.msk.bf16.vlgmr.msra.gmra.mrb[0].mxu1 %vm356_vm2, %v328_v26 }
  0x1f   : > { %813 = vmatpush3.bf16.msra.mxu0 %v848_v25 }
  0x20   : > { %814 = vmatprep.subr.bf16.mxu0 %v863_v1 }
  0x23   : > { %815 = vmatpush3.bf16.msra.mxu0 %v850_v27 }
  0x24   : > { %816 = vmatprep.subr.bf16.mxu0 %v863_v1 }
  0x27   : > { %817 = vmatpush3.bf16.msra.mxu0 %v852_v28 }
  0x28   : > { %818 = vmatprep.subr.bf16.mxu0 %v863_v1 }
  0x2b   : > { %819 = vmatpush3.bf16.msra.mxu0 %v525_v32 }
  0x2e   : > { %821 = vmatmul.mubr.msk.bf16.vlgmr.msra.gmra.mrb[0].mxu0 %vm356_vm2, %v493_v33 }
  0xef   : > { %v398_v34 = vpop.f32.mrb[0].mxu1 }
  0xf0   : > { %v794_v35 = vpop.f32.mrb[1].mxu1 }
  0xf1   : > { %v401_v36 = vpop.f32.mrb[2].mxu1 }
  0xf2   : > { %v795_v37 = vpop.f32.mrb[3].mxu1 }
 0x101   : > { %v561_v38 = vpop.f32.mrb[0].mxu0 }
 0x102   : > { %v824_v40 = vadd.f32 %v561_v38, %v398_v34  ;;  %v822_v41 = vpop.f32.mrb[1].mxu0 }
 0x103   : > { %v564_v43 = vpop.f32.mrb[2].mxu0 }
 0x104   : > { %v579_v44 = vmul.f32 %v824_v40, %v758_v39  ;;  %v825_v45 = vadd.f32 %v564_v43, %v401_v36  ;;  %v823_v46 = vpop.f32.mrb[3].mxu0 }
 0x106   : > { %v581_v49 = vadd.f32 %v579_v44, %v570_v42  ;;  %v580_v50 = vmul.f32 %v825_v45, %v758_v39 }
 0x108   : > { %v590_v51 = vadd.f32 %v759_v47, %v581_v49  ;;  %v582_v52 = vadd.f32 %v580_v50, %v571_v48 }
 0x10a   : > { %vm592_vm5 = vcmp.gt.f32.partialorder %v590_v51, 0.3  ;;  %v591_v53 = vadd.f32 %v759_v47, %v582_v52  ;;  %v600_v55 = vmul.f32 0.2, %v590_v51 }
 0x10b   : > { %v760_v54 = vsel %vm592_vm5, 1.0, %v863_v1 }
 0x10c   : > { %598 = vst [vmem:[%s283_s24] sm:$0xff] %v760_v54  ;;  %v602_v56 = vsub.f32 1.0, %v760_v54  ;;  %vm593_vm6 = vcmp.gt.f32.partialorder %v591_v53, 0.3  ;;  %v601_v59 = vmul.f32 0.2, %v591_v53 }
 0x10d   : > { %v761_v57 = vsel %vm593_vm6, 1.0, %v863_v1 }
 0x10e   : > { %v604_v58 = vmul.f32 %v602_v56, %v600_v55  ;;  %599 = vst [vmem:[%s283_s24 + $0x8] sm:$0xff] %v761_v57  ;;  %v603_v60 = vsub.f32 1.0, %v761_v57 }
 0x110   : > { %v605_v61 = vmul.f32 %v603_v60, %v601_v59  ;;  %606 = vst [vmem:[%s289_s27] sm:$0xff] %v604_v58 }
 0x112   : > { %607 = vst [vmem:[%s289_s27 + $0x8] sm:$0xff] %v605_v61 }
 0x113 PF: > { %s17_s21 = sadd.s32 1, %s861_s21  }
 0x114   : > { %p14_p5 = scmp.ge.s32.totalorder %s17_s21, 4  }
 0x116   :  { %16 = sbr.rel (!%p14_p5) target bundleno = 1 (0x1), region = 87 }

</bundles_post_ra>
